<compile_context>
chip_gen: v7x
topology: tpu7x:2x2x1
jax: 0.10.0
libtpu: 0.0.40
codegen_flags: <defaults>
</compile_context>

<pallas_src>
import jax
import jax.numpy as jnp
from jax.experimental import pallas as pl
from jax.experimental.pallas import tpu as pltpu


# ---------------------------------------------------------------------------
# helpers
# ---------------------------------------------------------------------------

def _round_up(x: int, m: int) -> int:
    return (x + m - 1) // m * m


def _vmem_capacity_bytes() -> int:
    """Per-core VMEM capacity; conservative default if the query fails."""
    try:
        return int(pltpu.get_tpu_info().vmem_capacity_bytes)
    except Exception:
        return 64 << 20  # v7x per-TensorCore VMEM (the smallest generation)


# Above this vocabulary the one-hot intermediate / MXU flops (both O(n)) stop
# being a good trade vs. direct VMEM row copies (O(nz), independent of n).
_ONE_HOT_MAX_N = 1024

# Rows gathered per grid step on the HBM (manual-DMA) path.
_HBM_TB = 16


# ---------------------------------------------------------------------------
# Path 1: table resident in VMEM, TB rows gathered per step via one-hot MXU
# matmul.
# ---------------------------------------------------------------------------

def _onehot_gather_kernel(idx_ref, w_ref, o_ref):
    tb = o_ref.shape[0]
    n = w_ref.shape[0]
    # idx_ref: (TB, 1) int32; build a (TB, n) one-hot selector and let the
    # MXU do the row gather:  out = one_hot @ W.
    vocab = jax.lax.broadcasted_iota(jnp.int32, (tb, n), 1)
    one_hot = (idx_ref[...] == vocab).astype(w_ref.dtype)
    o_ref[...] = jnp.dot(
        one_hot, w_ref[...], preferred_element_type=jnp.float32
    ).astype(o_ref.dtype)


def _onehot_gather_vmem(weight: jax.Array, idx_flat: jax.Array) -> jax.Array:
    n, nz = weight.shape
    b = idx_flat.shape[0]

    # Rows per grid step: >=8 (full sublanes), up to 256 (fills v6e/v7x MXU M
    # dim; on v5e this is just two 128-row MXU passes -- neutral -- and it
    # halves the number of ~0.35us grid steps everywhere).
    tb = min(256, _round_up(b, 8))
    b_pad = _round_up(b, tb)
    idx_pad = jnp.pad(idx_flat, (0, b_pad - b)).reshape(b_pad, 1)

    itemsize = jnp.dtype(weight.dtype).itemsize
    table_bytes = n * nz * itemsize              # single resident copy
    out_tile_bytes = tb * nz * itemsize
    idx_tile_bytes = tb * 128 * 4                # (TB, 1) i32 tile lane-padded
    onehot_bytes = tb * n * 4                    # (TB, n) f32 temporary

    vmem_needed = (table_bytes + 2 * out_tile_bytes + 2 * idx_tile_bytes
                   + onehot_bytes + (2 << 20))
    vmem_limit = int(min(max(vmem_needed, 32 << 20),
                         int(0.9 * _vmem_capacity_bytes())))

    cost = pl.CostEstimate(
        flops=2 * b_pad * n * nz,
        transcendentals=0,
        bytes_accessed=table_bytes + b_pad * nz * itemsize + b_pad * 4,
    )

    grid_spec = pltpu.PrefetchScalarGridSpec(
        num_scalar_prefetch=0,
        grid=(b_pad // tb,),
        in_specs=[
            # Per-tile indices.
            pl.BlockSpec((tb, 1), lambda i: (i, 0)),
            # Whole table: memory_space=VMEM -> placed in VMEM once, no
            # per-step DMA and no second prefetch buffer (single-buffered).
            pl.BlockSpec(memory_space=pltpu.MemorySpace.VMEM),
        ],
        out_specs=pl.BlockSpec((tb, nz), lambda i: (i, 0)),
    )

    out = pl.pallas_call(
        _onehot_gather_kernel,
        out_shape=jax.ShapeDtypeStruct((b_pad, nz), weight.dtype),
        grid_spec=grid_spec,
        compiler_params=pltpu.CompilerParams(
            dimension_semantics=("parallel",),  # disjoint output tiles
            vmem_limit_bytes=vmem_limit,
        ),
        cost_estimate=cost,
    )(idx_pad, weight)

    return out[:b]


# ---------------------------------------------------------------------------
# Path 2: table resident in VMEM, direct per-row dynamic-slice copies
# (medium n: avoids the O(n) one-hot / MXU cost, still no HBM row DMAs).
# ---------------------------------------------------------------------------

def _rowcopy_vmem_kernel(idx_ref, w_ref, o_ref):
    # idx_ref: full padded index vector in SMEM (scalar prefetch).
    # w_ref:   whole (n, nz) table resident in VMEM.
    tb = o_ref.shape[0]
    base = pl.program_id(0) * tb
    # Static unroll: store offsets are static, only the table-row load offset
    # is data-dependent (dynamic sublane slice).
    for r in range(tb):
        row = idx_ref[base + r]
        o_ref[pl.ds(r, 1), :] = w_ref[pl.ds(row, 1), :]


def _rowcopy_gather_vmem(weight: jax.Array, idx_flat: jax.Array) -> jax.Array:
    n, nz = weight.shape
    b = idx_flat.shape[0]
    tb = min(32, _round_up(b, 8))
    b_pad = _round_up(b, tb)
    idx_pad = jnp.pad(idx_flat, (0, b_pad - b))

    itemsize = jnp.dtype(weight.dtype).itemsize
    table_bytes = n * nz * itemsize
    vmem_needed = table_bytes + 2 * tb * nz * itemsize + (2 << 20)
    vmem_limit = int(min(max(vmem_needed, 32 << 20),
                         int(0.9 * _vmem_capacity_bytes())))

    cost = pl.CostEstimate(
        flops=0,
        transcendentals=0,
        bytes_accessed=table_bytes + 2 * b_pad * nz * itemsize,
    )

    grid_spec = pltpu.PrefetchScalarGridSpec(
        num_scalar_prefetch=1,
        grid=(b_pad // tb,),
        in_specs=[pl.BlockSpec(memory_space=pltpu.MemorySpace.VMEM)],
        out_specs=pl.BlockSpec((tb, nz), lambda i, idx_ref: (i, 0)),
    )

    out = pl.pallas_call(
        _rowcopy_vmem_kernel,
        out_shape=jax.ShapeDtypeStruct((b_pad, nz), weight.dtype),
        grid_spec=grid_spec,
        compiler_params=pltpu.CompilerParams(
            dimension_semantics=("parallel",),
            vmem_limit_bytes=vmem_limit,
        ),
        cost_estimate=cost,
    )(idx_pad, weight)

    return out[:b]


# ---------------------------------------------------------------------------
# Path 3: weight stays in HBM; TB data-dependent row DMAs per grid step
# (batched + overlapped), full (TB, nz) output tiles.
# ---------------------------------------------------------------------------

def _row_gather_hbm_kernel(idx_ref, w_hbm, o_ref, buf, sems):
    tb = o_ref.shape[0]
    base = pl.program_id(0) * tb
    # Issue all TB row DMAs so they are in flight concurrently ...
    for r in range(tb):
        row = idx_ref[base + r]
        pltpu.make_async_copy(
            w_hbm.at[pl.ds(row, 1), :], buf.at[pl.ds(r, 1), :], sems.at[r]
        ).start()
    # ... then wait on each and forward the assembled tile in one dense store.
    for r in range(tb):
        row = idx_ref[base + r]
        pltpu.make_async_copy(
            w_hbm.at[pl.ds(row, 1), :], buf.at[pl.ds(r, 1), :], sems.at[r]
        ).wait()
    o_ref[...] = buf[...]


def _row_gather_hbm(weight: jax.Array, idx_flat: jax.Array) -> jax.Array:
    n, nz = weight.shape
    b = idx_flat.shape[0]
    tb = min(_HBM_TB, _round_up(b, 8))
    b_pad = _round_up(b, tb)
    idx_pad = jnp.pad(idx_flat, (0, b_pad - b))
    itemsize = jnp.dtype(weight.dtype).itemsize

    cost = pl.CostEstimate(
        flops=0,
        transcendentals=0,
        bytes_accessed=2 * b_pad * nz * itemsize + b_pad * 4,
    )

    grid_spec = pltpu.PrefetchScalarGridSpec(
        num_scalar_prefetch=1,
        grid=(b_pad // tb,),
        in_specs=[pl.BlockSpec(memory_space=pl.ANY)],   # weight stays in HBM
        out_specs=pl.BlockSpec((tb, nz), lambda i, idx_ref: (i, 0)),
        scratch_shapes=[
            pltpu.VMEM((tb, nz), weight.dtype),
            pltpu.SemaphoreType.DMA((tb,)),
        ],
    )

    return pl.pallas_call(
        _row_gather_hbm_kernel,
        out_shape=jax.ShapeDtypeStruct((b_pad, nz), weight.dtype),
        grid_spec=grid_spec,
        compiler_params=pltpu.CompilerParams(
            # Disjoint output tiles -> shard steps across v7x's two cores.
            dimension_semantics=("parallel",),
        ),
        cost_estimate=cost,
    )(idx_pad, weight)[:b]


# ---------------------------------------------------------------------------
# Public forward: emb(idx).squeeze()
# ---------------------------------------------------------------------------

def embedding_forward(weight: jax.Array, idx: jax.Array, *,
                      path: str | None = None) -> jax.Array:
    """Pallas equivalent of `self.emb(idx).squeeze()`.

    weight: [n, nz] embedding table.
    idx:    integer indices of arbitrary shape.
    path:   None (auto) | "onehot" | "vmem_rowcopy" | "hbm_rowgather".
    """
    n, nz = weight.shape
    orig_shape = tuple(idx.shape)

    idx_flat = jnp.asarray(idx, jnp.int32).reshape(-1)
    # TODO(synk): torch nn.Embedding errors on out-of-range indices; we clamp.
    idx_flat = jnp.clip(idx_flat, 0, n - 1)
    b = int(idx_flat.shape[0])

    itemsize = jnp.dtype(weight.dtype).itemsize
    table_bytes = n * nz * itemsize
    # Table is single-buffered in VMEM now -> gate at ~0.8 * capacity.
    table_fits_vmem = table_bytes + (4 << 20) <= int(0.8 * _vmem_capacity_bytes())

    if path is None:
        if (8 * b < n) or not table_fits_vmem:
            # Tiny batch relative to the table (or table too big): only touch
            # the b requested rows in HBM instead of staging the whole table.
            path = "hbm_rowgather"
        elif n <= _ONE_HOT_MAX_N:
            path = "onehot"
        else:
            path = "vmem_rowcopy"

    if path in ("onehot", "vmem_rowcopy"):
        # Lane-dense output tiles: pad the embedding dim to a multiple of 128
        # (cheap for VMEM-resident tables; avoids masked partial stores).
        nz_pad = _round_up(nz, 128)
        w = weight if nz_pad == nz else jnp.pad(weight, ((0, 0), (0, nz_pad - nz)))
        fn = _onehot_gather_vmem if path == "onehot" else _rowcopy_gather_vmem
        gathered = fn(w, idx_flat)[:, :nz]
    elif path == "hbm_rowgather":
        # TODO(synk): skip nz padding here to avoid copying a huge HBM table.
        gathered = _row_gather_hbm(weight, idx_flat)
    else:
        raise ValueError(f"unknown path: {path}")

    out = gathered.reshape(orig_shape + (nz,))
    # PyTorch .squeeze(): drop all size-1 dims.
    return jnp.squeeze(out)


class NetZ:
    """JAX mirror of the PyTorch _netZ module (forward path only)."""

    def __init__(self, nz: int, n: int, key: jax.Array):
        self.n = n
        self.nz = nz
        # nn.Embedding default init: weight ~ N(0, 1).
        self.weight = jax.random.normal(key, (n, nz), dtype=jnp.float32)

    def get_norm(self):
        # Row-wise L2 normalization of the embedding table (plain JAX glue).
        wn = jnp.linalg.norm(self.weight, ord=2, axis=1, keepdims=True)
        self.weight = self.weight / wn

    def __call__(self, idx: jax.Array) -> jax.Array:
        return embedding_forward(self.weight, idx)


if __name__ == "__main__":
    key = jax.random.PRNGKey(0)
    k_w, k_w2, k_w3, k_i1, k_i2, k_i3 = jax.random.split(key, 6)

    n, nz = 64, 128
    model = NetZ(nz=nz, n=n, key=k_w)

    # 1) Auto dispatch -> one-hot MXU fast path (small table, batch = 8).
    idx1 = jax.random.randint(k_i1, (8,), 0, n, dtype=jnp.int32)
    z1 = jax.block_until_ready(model(idx1))
    ref1 = jnp.squeeze(jnp.take(model.weight, idx1, axis=0))
    assert z1.shape == ref1.shape, (z1.shape, ref1.shape)
    assert jnp.allclose(z1, ref1, atol=1e-5), "one-hot path mismatch vs reference"

    # 2) One-hot path with a batch that is not a multiple of 8 (padding).
    idx2 = jax.random.randint(k_i2, (20,), 0, n, dtype=jnp.int32)
    z2 = jax.block_until_ready(model(idx2))
    ref2 = jnp.take(model.weight, idx2, axis=0)
    assert z2.shape == ref2.shape, (z2.shape, ref2.shape)
    assert jnp.allclose(z2, ref2, atol=1e-5), "padded one-hot path mismatch"

    # 3) Forced VMEM row-copy path (exact gather, the medium-n route).
    z3 = jax.block_until_ready(
        embedding_forward(model.weight, idx2, path="vmem_rowcopy"))
    assert z3.shape == ref2.shape, (z3.shape, ref2.shape)
    assert jnp.array_equal(z3, ref2), "vmem_rowcopy path mismatch"

    # 4) Forced HBM batched row-gather path (manual overlapped DMAs).
    z4 = jax.block_until_ready(
        embedding_forward(model.weight, idx2, path="hbm_rowgather"))
    assert z4.shape == ref2.shape, (z4.shape, ref2.shape)
    assert jnp.array_equal(z4, ref2), "hbm_rowgather path mismatch"

    # 5) Auto dispatch: tiny batch vs. a 2048-row table -> HBM row gather.
    n2 = 2048
    w2 = jax.random.normal(k_w2, (n2, 128), dtype=jnp.float32)
    idx3 = jax.random.randint(k_i3, (16,), 0, n2, dtype=jnp.int32)
    z5 = jax.block_until_ready(embedding_forward(w2, idx3))
    ref5 = jnp.take(w2, idx3, axis=0)
    assert z5.shape == ref5.shape, (z5.shape, ref5.shape)
    assert jnp.array_equal(z5, ref5), "auto hbm dispatch mismatch"

    # 6) Non-lane-aligned embedding dim (nz=80): padded to 128 internally.
    w3 = jax.random.normal(k_w3, (64, 80), dtype=jnp.float32)
    z6 = jax.block_until_ready(embedding_forward(w3, idx1))
    ref6 = jnp.squeeze(jnp.take(w3, idx1, axis=0))
    assert z6.shape == ref6.shape, (z6.shape, ref6.shape)
    assert jnp.allclose(z6, ref6, atol=1e-5), "nz-padding path mismatch"

    print("KERNEL_OK")
</pallas_src>

<mosaic_0001>
module attributes {stable_mosaic.version = 11 : i64} {
  func.func @_onehot_gather_kernel(%arg0: i32, %arg1: memref<8x1xi32, #tpu.memory_space<vmem>>, %arg2: memref<64x128xf32, #tpu.memory_space<vmem>>, %arg3: memref<8x128xf32, #tpu.memory_space<vmem>>) attributes {dimension_semantics = [#tpu.dimension_semantics<parallel>], iteration_bounds = array<i64: 1>, scalar_prefetch = 0 : i64, scratch_operands = 0 : i64, tpu.core_type = #tpu.core_type<tc>, window_params = [{transform_indices = @transform_0, window_bounds = array<i64: 8, 1>}, {pipeline_mode = #tpu.pipeline_mode<synchronous>, transform_indices = @transform_1, window_bounds = array<i64: 64, 128>}, {transform_indices = @transform_2, window_bounds = array<i64: 8, 128>}]} {
    %0 = tpu.iota {dimensions = array<i32: 1>} : vector<8x64xi32>
    %c0 = arith.constant 0 : index
    %c0_0 = arith.constant 0 : index
    %1 = vector.load %arg1[%c0, %c0_0] : memref<8x1xi32, #tpu.memory_space<vmem>>, vector<8x1xi32>
    %2 = vector.broadcast %1 : vector<8x1xi32> to vector<8x64xi32>
    %3 = arith.cmpi eq, %2, %0 : vector<8x64xi32>
    %4 = arith.extui %3 : vector<8x64xi1> to vector<8x64xi32>
    %5 = arith.sitofp %4 : vector<8x64xi32> to vector<8x64xf32>
    %c0_1 = arith.constant 0 : index
    %c0_2 = arith.constant 0 : index
    %6 = vector.load %arg2[%c0_1, %c0_2] : memref<64x128xf32, #tpu.memory_space<vmem>>, vector<64x128xf32>
    %cst = arith.constant dense<0.000000e+00> : vector<8x128xf32>
    %7 = tpu.matmul %5, %6, %cst {dimension_numbers = #tpu.dot_dimension_numbers<[1], [0], [0], [1], [0, 0, 1, 1], [], []>} : vector<8x64xf32>, vector<64x128xf32>, vector<8x128xf32> -> vector<8x128xf32>
    %c0_3 = arith.constant 0 : index
    %c0_4 = arith.constant 0 : index
    %8 = vector.load %arg3[%c0_3, %c0_4] : memref<8x128xf32, #tpu.memory_space<vmem>>, vector<8x128xf32>
    tpu.vector_store %arg3[%c0_3, %c0_4], %7 {strides = array<i32>} : memref<8x128xf32, #tpu.memory_space<vmem>>, vector<8x128xf32>,
    return
  }
  func.func @transform_0(%arg0: i32) -> (i32, i32) {
    %c0_i32 = arith.constant 0 : i32
    %c0_i32_0 = arith.constant 0 : i32
    return %arg0, %c0_i32 : i32, i32
  }
  func.func @transform_1(%arg0: i32) -> (i32, i32) {
    %c0_i32 = arith.constant 0 : i32
    %c0_i32_0 = arith.constant 0 : i32
    %c0_i32_1 = arith.constant 0 : i32
    return %c0_i32, %c0_i32_0 : i32, i32
  }
  func.func @transform_2(%arg0: i32) -> (i32, i32) {
    %c0_i32 = arith.constant 0 : i32
    %c0_i32_0 = arith.constant 0 : i32
    return %arg0, %c0_i32 : i32, i32
  }
}

</mosaic_0001>

<bundles_post_ra>
// kernel: tpu_custom_call.1
= control target key start
LH: loop header
LB: loop body
LE: loop exit
PB: predicated region body
PF: predicated region fallthrough
CT: control target
= control target key end

     0   :  { %7 = vsyncpa [#allocation3], 0  ;;  %s282_s0 = inlined_call_operand.vmem [shape: s32[8,1], index: 0, kind: input, shape index: {}]   ;;  %s283_s1 = inlined_call_operand.hbm [shape: f32[64,128], index: 1, kind: input, shape index: {}]   ;;  %s284_s2 = inlined_call_operand.hbm [shape: f32[8,128], index: 2, kind: output, shape index: {}]  }
   0x1   :  { %8 = vsyncpa [#allocation4], 0  ;;  %s232_s9 = smov [#allocation2]   ;;  %s184_s13 = scalar_lea.hbm %s283_s1, 1024 }
   0x2   :  { %s16_s10 = sshll.u32 %s232_s9, 4  ;;  %p185_p0 = scmp.ne.s32.totalorder %s283_s1, %s184_s13  ;;  %s17_s10 = int_to_ptr.vmem [resolvable:$true] %s16_s10 }
   0x3   :  { %p188_p1 = scmp.lt.u32.totalorder %s184_s13, %s283_s1 }
   0x5   :  { %p190_p2 = pnand %p188_p1, %p185_p0 }
   0x7   :  { %193 = shalt.err (!%p190_p2)
}
   0x8   :  { %s194_s18 = scalar_lea.vmem %s17_s10, 1024  ;;  %p199_p4 = scmp.lt.s32.totalorder %s17_s10, %s17_s10 }
   0x9   :  { %p195_p3 = scmp.ne.s32.totalorder %s17_s10, %s194_s18  ;;  %p200_p5 = scmp.lt.s32.totalorder %s194_s18, %s194_s18 }
   0xb   :  { %p201_p6 = por %p200_p5, %p199_p4 }
   0xd   :  { %p202_p7 = pnand %p201_p6, %p195_p3 }
   0xf   :  { %205 = shalt.err (!%p202_p7)
}
  0x10   :  { %s233_s19 = smov 128   ;;  %s234_s20 = smov 8  }
  0x11   :  { %22 = dma.hbm_to_vmem [thread:$0]  %s283_s1, 1024, %s17_s10, [#allocation3], %s233_s19, %s233_s19, %s234_s20  }
  0x12   :  { %228 = dma.done.wait [#allocation3], 1024  }
  0x13   :  { %229 = vsyncadd [#allocation3], 4294966272  ;;  %v235_v0 = vmov 0   ;;  %v236_v1 = vmov 0.0|0.0   ;;  %v28_v2 = vld [vmem:[%s282_s0] sm:$0xff]  ;;  %v36_v4 = vld [vmem:[#allocation2 + $0x8] sm:$0xff]  ;;  %v26_v16 = vlaneseq }
  0x14   :  { %183 = vset.pattern.permute.xlu0 %v235_v0  ;;  %163 = vmatprep.subr.bf16.mxu0 %v236_v1  ;;  %v35_v3 = vld [vmem:[#allocation2] sm:$0xff]  ;;  %v37_v6 = vld [vmem:[#allocation2 + $0x10] sm:$0xff]  ;;  %v38_v7 = vld [vmem:[#allocation2 + $0x18] sm:$0xff]  ;;  %vm237_vm0 = vmmov 0   ;;  %v238_v8 = vmov 0.0   ;;  %vm43_vm1 = vcmask 523264  }
  0x15   :  { %30 = vperm.xlu0 %183, %v28_v2   ;;  %v164_v5 = vpack.c.bf16 %v36_v4, %v35_v3  ;;  %160 = vmatprep.mubr.msk.f32.mxu0 %vm237_vm0, %v238_v8  ;;  %v167_v9 = vpack.c.bf16 %v38_v7, %v37_v6  ;;  %v39_v10 = vld [vmem:[#allocation2 + $0x20] sm:$0xff]  ;;  %v40_v11 = vld [vmem:[#allocation2 + $0x28] sm:$0xff]  ;;  %v41_v13 = vld [vmem:[#allocation2 + $0x30] sm:$0xff]  ;;  %v27_v17 = vand.u32 127, %v26_v16  ;;  %s239_s0 = smov [#allocation5]  }
  0x16   :  { %v170_v12 = vpack.c.bf16 %v40_v11, %v39_v10  ;;  %v42_v14 = vld [vmem:[#allocation2 + $0x38] sm:$0xff]  ;;  %s124_s1 = sshll.u32 %s239_s0, 4  ;;  %s125_s1 = int_to_ptr.vmem [resolvable:$true] %s124_s1 }
  0x17   :  { %165 = vmatpush3.bf16.msra.mxu0 %v164_v5  ;;  %v173_v15 = vpack.c.bf16 %v42_v14, %v41_v13  ;;  %s206_s25 = scalar_lea.vmem %s125_s1, 128  ;;  %p211_p9 = scmp.lt.s32.totalorder %s125_s1, %s125_s1 }
  0x18   :  { %166 = vmatprep.subr.bf16.mxu0 %v236_v1  ;;  %p207_p8 = scmp.ne.s32.totalorder %s125_s1, %s206_s25  ;;  %p212_p10 = scmp.lt.s32.totalorder %s206_s25, %s206_s25 }
  0x1a   :  { %p213_p11 = por %p212_p10, %p211_p9 }
  0x1b   :  { %168 = vmatpush3.bf16.msra.mxu0 %v167_v9 }
  0x1c   :  { %169 = vmatprep.subr.bf16.mxu0 %v236_v1  ;;  %p214_p12 = pnand %p213_p11, %p207_p8 }
  0x1f   :  { %171 = vmatpush3.bf16.msra.mxu0 %v170_v12 }
  0x20   :  { %172 = vmatprep.subr.bf16.mxu0 %v236_v1 }
  0x23   :  { %174 = vmatpush3.bf16.msra.mxu0 %v173_v15 }
  0x94   :  { %v31_v18 = vpop.permute.xlu0 %30 }
  0x95   :  { %vm32_vm2 = vcmp.eq.s32.totalorder %v31_v18, %v27_v17 }
  0x96   :  { %v133_v19 = vsel %vm32_vm2, 1.0, %v238_v8 }
  0x97   :  { %161 = vmatmul.mubr.msk.f32.vlgmr.msra.gmra.mrb[0].mxu0 %vm43_vm1, %v133_v19 }
 0x16a   :  { %v113_v20 = vpop.f32.mrb[0].mxu0 }
 0x16b   :  { %117 = vst [vmem:[#allocation5] sm:$0xff] %v113_v20  ;;  %v162_v21 = vpop.f32.mrb[1].mxu0 }
 0x16c   :  { %217 = shalt.err (!%p214_p12)
}
 0x16d   :  { %s218_s28 = scalar_lea.hbm %s284_s2, 128 }
 0x16e   :  { %p219_p13 = scmp.ne.s32.totalorder %s284_s2, %s218_s28  ;;  %p222_p0 = scmp.lt.u32.totalorder %s218_s28, %s284_s2 }
 0x170   :  { %p224_p1 = pnand %p222_p0, %p219_p13 }
 0x172   :  { %227 = shalt.err (!%p224_p1)
}
 0x173   :  { %127 = dma.vmem_to_hbm [thread:$0]  %s125_s1, 128, %s284_s2, [#allocation4]  }
 0x174   :  { %230 = dma.done.wait [#allocation4], 128  }
 0x175   :  { %231 = vsyncadd [#allocation4], 4294967168 }
 0x176   :  { %131 = vsyncpa [#allocation3], 1 }
 0x177   :  { %132 = vsyncpa [#allocation4], 1 }

</bundles_post_ra>
